<compile_context>
chip_gen: v6e
topology: v6e:2x2x1
jax: 0.10.0
libtpu: 0.0.40
codegen_flags: <defaults>
</compile_context>

<pallas_src>
import functools

import jax
import jax.numpy as jnp
from jax.experimental import pallas as pl
from jax.experimental.pallas import tpu as pltpu

IN_FEATURES = 10
OUT_FEATURES = 1

_LANE = 128                 # lane width: batch tiles must be multiples of this
_TB_MAX = 32768             # max batch (lane) tile per grid step (~2 MiB/step)
_PALLAS_MIN_BATCH = 1 << 17 # below this, a fused XLA expression wins


def _simplenet_kernel(x12_ref, w_ref, b_ref, o_ref):
    # x12_ref : [IN_FEATURES, TB]  pre-summed (X1+X2), features on sublanes,
    #                              batch on lanes
    # w_ref   : [IN_FEATURES, 1]   broadcast along the lane/batch axis
    # b_ref   : [1, 1]             nn.Linear bias, scalar in SMEM
    # o_ref   : [1, TB]            lane-dense output
    y = jnp.sum(x12_ref[...] * w_ref[...], axis=0, keepdims=True)  # VPU mul + sublane reduce
    z = y + 2.0 * b_ref[0, 0]          # bias counted twice (fc1 applied to X1 and X2)
    o_ref[...] = jax.nn.sigmoid(z).astype(o_ref.dtype)


def _xla_fast_path(X1, X2, w_col, b):
    # Small-batch path: one fused XLA expression, no relayout / pallas launch.
    return jax.nn.sigmoid((X1 + X2) @ w_col + 2.0 * b)


def _select_tile(padded):
    """Pick a 128-multiple lane tile; keep >=2 grid steps when possible (v7x)."""
    if padded >= 2 * _LANE:
        half = (padded // 2) // _LANE * _LANE
        tb = min(_TB_MAX, max(_LANE, half))
    else:
        tb = _LANE
    return tb


@functools.partial(jax.jit, static_argnames=("force_pallas",))
def simplenet_forward(X1, X2, X3=None, odds1=None, odds2=None, *,
                      params, force_pallas=False):
    """Pallas equivalent of SimpleNet.forward. X3/odds are unused (as in PyTorch)."""
    w_col, b = params                    # w_col: [10, 1], b: [1, 1]
    batch = X1.shape[0]

    if not force_pallas and batch < _PALLAS_MIN_BATCH:
        return _xla_fast_path(X1, X2, w_col, b)

    # Tile / grid selection.
    padded = -(-batch // _LANE) * _LANE
    tb = _select_tile(padded)
    padded = -(-padded // tb) * tb
    grid = (padded // tb,)

    # Relayout pass: fold the X1+X2 add into the transpose+pad so the kernel
    # reads a single lane-dense array.  Under jit, XLA fuses add+transpose+pad
    # into one producer fusion.
    x12_t = jnp.pad(jnp.transpose(X1 + X2), ((0, 0), (0, padded - batch)))

    out_t = pl.pallas_call(
        _simplenet_kernel,
        out_shape=jax.ShapeDtypeStruct((1, padded), jnp.float32),
        grid_spec=pltpu.PrefetchScalarGridSpec(
            num_scalar_prefetch=0,
            grid=grid,
            in_specs=[
                pl.BlockSpec((IN_FEATURES, tb), lambda i: (0, i)),
                pl.BlockSpec((IN_FEATURES, OUT_FEATURES), lambda i: (0, 0)),
                pl.BlockSpec(memory_space=pltpu.MemorySpace.SMEM),   # bias scalar
            ],
            out_specs=pl.BlockSpec((1, tb), lambda i: (0, i)),
        ),
        compiler_params=pltpu.CompilerParams(
            dimension_semantics=("parallel",),
            vmem_limit_bytes=32 * 1024 * 1024,   # larger tiles OK even on v5e's 16 MiB default
        ),
    )(x12_t, w_col, b)

    # Back to the PyTorch-shaped [batch, 1] output.
    return jnp.transpose(out_t[:, :batch])


def init_params(key):
    """Deterministic init mirroring nn.Linear(10, 1).

    PyTorch stores weight as [out, in]; we keep the column [in, out] = [10, 1]
    so it broadcasts along the batch/lane axis inside the kernel. Init uses the
    same uniform(-1/sqrt(in), 1/sqrt(in)) range."""
    k_w, k_b = jax.random.split(key)
    bound = 1.0 / jnp.sqrt(jnp.float32(IN_FEATURES))
    w = jax.random.uniform(
        k_w, (OUT_FEATURES, IN_FEATURES), jnp.float32, -bound, bound
    )
    b = jax.random.uniform(k_b, (OUT_FEATURES,), jnp.float32, -bound, bound)
    w_col = jnp.transpose(w)             # [in_features, out_features] = [10, 1]
    b2d = b.reshape(1, OUT_FEATURES)     # [1, 1]
    return w_col, b2d


def _reference(X1, X2, params):
    w_col, b = params
    return jax.nn.sigmoid(X1 @ w_col + b + X2 @ w_col + b)


if __name__ == "__main__":
    key = jax.random.PRNGKey(0)
    k1, k2, k3, kp, k4, k5 = jax.random.split(key, 6)
    params = init_params(kp)

    # Small test: single grid step (batch padded up to one 128-lane tile).
    batch = 8
    X1 = jax.random.normal(k1, (batch, IN_FEATURES), jnp.float32)
    X2 = jax.random.normal(k2, (batch, IN_FEATURES), jnp.float32)
    X3 = jax.random.normal(k3, (batch, IN_FEATURES), jnp.float32)  # unused, like PyTorch

    ref = _reference(X1, X2, params)

    out = jax.block_until_ready(
        simplenet_forward(X1, X2, X3, params=params, force_pallas=True))
    assert out.shape == (batch, OUT_FEATURES)
    assert jnp.allclose(out, ref, atol=1e-5), "mismatch vs reference (pallas, small batch)"

    out_fast = jax.block_until_ready(
        simplenet_forward(X1, X2, X3, params=params))          # auto small-batch fast path
    assert jnp.allclose(out_fast, ref, atol=1e-5), "mismatch vs reference (fast path)"

    # Larger, non-aligned batch: exercises the multi-step (>=2, v7x-friendly)
    # parallel grid path.
    big = 3000
    Y1 = jax.random.normal(k4, (big, IN_FEATURES), jnp.float32)
    Y2 = jax.random.normal(k5, (big, IN_FEATURES), jnp.float32)
    out_big = jax.block_until_ready(
        simplenet_forward(Y1, Y2, params=params, force_pallas=True))
    ref_big = _reference(Y1, Y2, params)
    assert out_big.shape == (big, OUT_FEATURES)
    assert jnp.allclose(out_big, ref_big, atol=1e-5), "mismatch vs reference (big batch)"

    print("KERNEL_OK")
</pallas_src>

<mosaic_0001>
module attributes {stable_mosaic.version = 11 : i64} {
  func.func @_simplenet_kernel(%arg0: i32, %arg1: memref<10x128xf32, #tpu.memory_space<vmem>>, %arg2: memref<10x1xf32, #tpu.memory_space<vmem>>, %arg3: memref<1x1xf32, #tpu.memory_space<smem>>, %arg4: memref<1x128xf32, #tpu.memory_space<vmem>>) attributes {dimension_semantics = [#tpu.dimension_semantics<parallel>], iteration_bounds = array<i64: 1>, scalar_prefetch = 0 : i64, scratch_operands = 0 : i64, tpu.core_type = #tpu.core_type<tc>, window_params = [{transform_indices = @transform_0, window_bounds = array<i64: 10, 128>}, {pipeline_mode = #tpu.pipeline_mode<synchronous>, transform_indices = @transform_1, window_bounds = array<i64: 10, 1>}, {transform_indices = @transform_2, window_bounds = array<i64: 1, 1>}, {transform_indices = @transform_3, window_bounds = array<i64: 1, 128>}]} {
    %c0 = arith.constant 0 : index
    %c0_0 = arith.constant 0 : index
    %0 = vector.load %arg1[%c0, %c0_0] : memref<10x128xf32, #tpu.memory_space<vmem>>, vector<10x128xf32>
    %c0_1 = arith.constant 0 : index
    %c0_2 = arith.constant 0 : index
    %1 = vector.load %arg2[%c0_1, %c0_2] : memref<10x1xf32, #tpu.memory_space<vmem>>, vector<10x1xf32>
    %2 = vector.broadcast %1 : vector<10x1xf32> to vector<10x128xf32>
    %3 = arith.mulf %0, %2 : vector<10x128xf32>
    %cst = arith.constant dense<0.000000e+00> : vector<128xf32>
    %4 = vector.multi_reduction <add>, %3, %cst [0] : vector<10x128xf32> to vector<128xf32>
    %5 = vector.shape_cast %4 : vector<128xf32> to vector<1x128xf32>
    %c0_3 = arith.constant 0 : index
    %c0_4 = arith.constant 0 : index
    %6 = memref.load %arg3[%c0_3, %c0_4] : memref<1x1xf32, #tpu.memory_space<smem>>
    %cst_5 = arith.constant 2.000000e+00 : f32
    %7 = arith.mulf %cst_5, %6 : f32
    %8 = vector.broadcast %7 : f32 to vector<1x128xf32>
    %9 = arith.addf %5, %8 : vector<1x128xf32>
    %10 = arith.negf %9 : vector<1x128xf32>
    %11 = math.exp %10 : vector<1x128xf32>
    %cst_6 = arith.constant 1.000000e+00 : f32
    %12 = vector.broadcast %cst_6 : f32 to vector<1x128xf32>
    %13 = arith.addf %12, %11 : vector<1x128xf32>
    %14 = arith.divf %12, %13 : vector<1x128xf32>
    %c0_7 = arith.constant 0 : index
    %c0_8 = arith.constant 0 : index
    %15 = vector.load %arg4[%c0_7, %c0_8] : memref<1x128xf32, #tpu.memory_space<vmem>>, vector<1x128xf32>
    tpu.vector_store %arg4[%c0_7, %c0_8], %14 {strides = array<i32>} : memref<1x128xf32, #tpu.memory_space<vmem>>, vector<1x128xf32>,
    return
  }
  func.func @transform_0(%arg0: i32) -> (i32, i32) {
    %c0_i32 = arith.constant 0 : i32
    %c0_i32_0 = arith.constant 0 : i32
    return %c0_i32, %arg0 : i32, i32
  }
  func.func @transform_1(%arg0: i32) -> (i32, i32) {
    %c0_i32 = arith.constant 0 : i32
    %c0_i32_0 = arith.constant 0 : i32
    %c0_i32_1 = arith.constant 0 : i32
    return %c0_i32, %c0_i32_0 : i32, i32
  }
  func.func @transform_2(%arg0: i32) -> (i32, i32) {
    %c0_i32 = arith.constant 0 : i32
    %c0_i32_0 = arith.constant 0 : i32
    %c0_i32_1 = arith.constant 0 : i32
    return %c0_i32, %c0_i32_0 : i32, i32
  }
  func.func @transform_3(%arg0: i32) -> (i32, i32) {
    %c0_i32 = arith.constant 0 : i32
    %c0_i32_0 = arith.constant 0 : i32
    return %c0_i32, %arg0 : i32, i32
  }
}

</mosaic_0001>

<bundles_post_ra>
// kernel: simplenet_forward.1
= control target key start
LH: loop header
LB: loop body
LE: loop exit
PB: predicated region body
PF: predicated region fallthrough
CT: control target
= control target key end

     0   :  { %v62_v0 = vmov 0   ;;  %vm31_vm0 = vcmask 1041408   ;;  %s101_s1 = inlined_call_operand.vmem [shape: f32[10,1], index: 1, kind: input, shape index: {}]   ;;  %s102_s0 = inlined_call_operand.vmem [shape: f32[10,128], index: 0, kind: input, shape index: {}]   ;;  %s103_s2 = inlined_call_operand.<no memory space> [shape: f32[1,1], index: 2, kind: input, shape index: {}]   ;;  %s104_s3 = inlined_call_operand.vmem [shape: f32[1,128], index: 3, kind: output, shape index: {}]  }
   0x1   :  { %57 = vset.pattern.permute.xlu0 %v62_v0  ;;  %v18_v1 = vld [vmem:[%s101_s1 + $0x8] sm:$0x3]  ;;  %v17_v2 = vld [vmem:[%s101_s1] sm:$0xff]  ;;  %s41_s21 = smul.f32 2.0, %s103_s2 }
   0x2   :  { %26 = vperm.xlu0 %57, %v18_v1   ;;  %v16_v3 = vld [vmem:[%s102_s0 + $0x8] sm:$0x3]  ;;  %v15_v6 = vld [vmem:[%s102_s0] sm:$0xff] }
   0x3   :  { %v42_v16 = vstv %s41_s21 }
   0x6   :  { %21 = vperm.xlu0 %57, %v17_v2  }
  0x7d   :  { %v27_v4 = vpop.permute.xlu0 %26 }
  0x7e   :  { %v30_v5 = vmul.f32 %v27_v4, %v16_v3 }
  0x80   :  { %v32_v9 = vsel %vm31_vm0, %v30_v5, 0.0 }
  0x81   :  { %v22_v7 = vpop.permute.xlu0 %21 }
  0x82   :  { %v29_v8 = vmul.f32 %v22_v7, %v15_v6 }
  0x84   :  { %v33_v10 = vadd.f32 %v32_v9, %v29_v8 }
  0x86   :  { %v34_v11 = vrot.slane %v33_v10, 4 }
  0x88   :  { %v35_v12 = vadd.f32 %v34_v11, %v33_v10 }
  0x8a   :  { %v36_v13 = vrot.slane %v35_v12, 2 }
  0x8c   :  { %v37_v14 = vadd.f32 %v36_v13, %v35_v12 }
  0x8e   :  { %v38_v15 = vrot.slane %v37_v14, 1 }
  0x90   :  { %v39_v17 = vadd.f32 %v38_v15, %v37_v14 }
  0x92   :  { %v43_v18 = vadd.f32 %v42_v16, %v39_v17 }
  0x94   :  { %v55_v19 = vmul.f32 -1.442695, %v43_v18 }
  0x96   :  { %58 = vpow2.f32 %v55_v19 }
  0xa3   :  { %v59_v20 = vpop.eup %58 }
  0xa4   :  { %v47_v21 = vadd.f32 1.0, %v59_v20 }
  0xa6   :  { %60 = vrcp.f32 %v47_v21 }
  0xb3   :  { %v61_v22 = vpop.eup %60 }
  0xb4   :  { %50 = vst [vmem:[%s104_s3] sm:$0x1] %v61_v22 }

</bundles_post_ra>
